<compile_context>
chip_gen: v5e
topology: v5e:2x2
jax: 0.10.0
libtpu: 0.0.40
codegen_flags: <defaults>
</compile_context>

<pallas_src>
import numpy as np
import jax
import jax.numpy as jnp
from jax.experimental import pallas as pl
from jax.experimental.pallas import tpu as pltpu

# Python float (NOT a jnp scalar) so the kernels do not capture a traced constant.
_NEG = -3.0e38


def _round_up(a, m):
    return -(-a // m) * m


def _pool_kernel(x_ref, bid_ref, w1_ref, b1_ref, w2_ref, b2_ref,
                 expand_ref, rmat_ref, lb_ref, sum_ref, max_ref):
    """Pass 1: per-batch (packed) sum / max of the query MLP.

    Accumulates straight into the per-core output blocks:
      sum_ref : [1, pack*B, pack*C]  -- row p*B+b holds the sum for sub-position p
      max_ref : [1, B, pack*C]       -- per-batch max, still per sub-position
    The tiny cross-sub-position collapse + sigmoid happens in the wrapper.
    """
    @pl.when(pl.program_id(1) == 0)
    def _init():
        sum_ref[...] = jnp.zeros(sum_ref.shape, jnp.float32)
        max_ref[...] = jnp.full(max_ref.shape, _NEG, jnp.float32)

    x = x_ref[...].astype(jnp.float32)        # [TNp, pack*C]  lane-dense
    bid = bid_ref[...]                        # [TNp, pack]    float batch ids

    # --- query MLP on the MXU (block-diagonal weights keep it lane-dense) ---
    h = jnp.dot(x, w1_ref[...], preferred_element_type=jnp.float32) + b1_ref[...]
    h = jnp.maximum(h, 0.0)                   # [TNp, pack*H]
    q = jnp.dot(h, w2_ref[...], preferred_element_type=jnp.float32) + b2_ref[...]

    # --- one-hot [TNp, pack*B]: column p*B+b == 1 iff sub-point p is in batch b ---
    bid_rep = jnp.dot(bid, rmat_ref[...], preferred_element_type=jnp.float32)
    onehot = (bid_rep == lb_ref[...]).astype(jnp.float32)

    # --- sum pool: single MXU matmul contracting the row axis ---
    t = jax.lax.dot_general(onehot, q, (((0,), (0,)), ((), ())),
                            preferred_element_type=jnp.float32)   # [pack*B, pack*C]
    sum_ref[...] = sum_ref[...] + t[None]

    # --- max pool: per-batch masked row max (lane-dense mask from one matmul) ---
    # TODO(synk): for large B switch to a sorted-segment / scalar-prefetch scheme;
    # this loop is O(B) on the VPU (B is small for point-cloud batches).
    bid_dense = jnp.dot(bid, expand_ref[...], preferred_element_type=jnp.float32)
    n_batches = max_ref.shape[1]
    tile_max = [jnp.max(jnp.where(bid_dense == b, q, _NEG), axis=0, keepdims=True)
                for b in range(n_batches)]
    tile_max = jnp.concatenate(tile_max, axis=0)                  # [B, pack*C]
    max_ref[...] = jnp.maximum(max_ref[...], tile_max[None])


def _apply_kernel(bid_ref, rmat_ref, lb_ref, gmat_ref, x_ref, out_ref):
    """Pass 2: out = sigmoid_gate[batch] * x, lane-dense, one MXU gather-matmul."""
    bid = bid_ref[...]                                            # [TNp, pack]
    bid_rep = jnp.dot(bid, rmat_ref[...], preferred_element_type=jnp.float32)
    onehot = (bid_rep == lb_ref[...]).astype(jnp.float32)         # [TNp, pack*B]
    g = jnp.dot(onehot, gmat_ref[...], preferred_element_type=jnp.float32)
    out_ref[...] = (g * x_ref[...].astype(jnp.float32)).astype(out_ref.dtype)


def attention_forward(x, batch, w1, b1, w2, b2, num_batches, tile_n=16384):
    """x: [N, C] f32, batch: [N] int in [0, num_batches).
    w1: [C, H], b1: [H], w2: [H, C], b2: [C]   (weights stored as [in, out])."""
    N, C = x.shape
    H = w1.shape[1]
    B = int(num_batches)

    # Lane-packing factor (e.g. C=32 -> 4 points per 128-lane row).
    pack = 128 // C if (C < 128 and 128 % C == 0) else 1
    step = 8 * pack                       # sublane(8) x packing alignment

    # Tile sizing: big tiles hide the ~0.35us per-grid-step overhead, while the
    # cap keeps the pass-2 double-buffered working set (x + out + bid, x2 buffers)
    # safely inside the smallest default scoped-VMEM limit (v5e 16 MiB; v7x has
    # only 64 MiB physical VMEM).
    bytes_per_point = 2 * (8 * C + 4)
    vmem_budget = 12 * 1024 * 1024
    cap = max(step, (vmem_budget // bytes_per_point // step) * step)
    tile_n = max(step, (min(int(tile_n), cap) // step) * step)
    # Don't tile far past the input (small-N / unit-test path).
    tile_n = min(tile_n, _round_up(max(-(-N // 2), 1), step))

    n_pad = _round_up(N, 2 * tile_n)      # even #tiles -> clean 2-way core split
    nt = n_pad // tile_n
    nt_half = nt // 2
    tnp = tile_n // pack

    batch = batch.astype(jnp.int32)
    # Clamped reciprocal counts, precomputed once (no in-kernel divide / 0/0 NaN).
    counts = jax.ops.segment_sum(jnp.ones((N,), jnp.float32), batch, num_segments=B)
    inv_cnt = (1.0 / jnp.maximum(counts, 1.0)).reshape(B, 1)

    xf = jnp.asarray(x)
    bidf = batch.astype(jnp.float32)      # float ids: exact equality for small ints
    if n_pad != N:
        xf = jnp.concatenate([xf, jnp.zeros((n_pad - N, C), xf.dtype)], axis=0)
        # dummy batch id == B -> padded rows match no pool column and get a 0 gate
        bidf = jnp.concatenate(
            [bidf, jnp.full((n_pad - N,), float(B), jnp.float32)], axis=0)

    x_packed = xf.reshape(n_pad // pack, pack * C)
    bid_packed = bidf.reshape(n_pad // pack, pack)

    # Small resident constants (DMA'd once via constant index_maps).
    eye_p = jnp.eye(pack, dtype=jnp.float32)
    w1_bd = jnp.kron(eye_p, jnp.asarray(w1, jnp.float32))         # [pack*C, pack*H]
    w2_bd = jnp.kron(eye_p, jnp.asarray(w2, jnp.float32))         # [pack*H, pack*C]
    b1_t = jnp.tile(jnp.asarray(b1, jnp.float32), pack).reshape(1, pack * H)
    b2_t = jnp.tile(jnp.asarray(b2, jnp.float32), pack).reshape(1, pack * C)
    expand = jnp.kron(eye_p, jnp.ones((1, C), jnp.float32))       # [pack, pack*C]
    rmat = jnp.kron(eye_p, jnp.ones((1, B), jnp.float32))         # [pack, pack*B]
    lb = jnp.tile(jnp.arange(B, dtype=jnp.float32), pack).reshape(1, pack * B)

    # ---------------- pass 1: per-core partial per-batch pools ----------------
    sum_part, max_part = pl.pallas_call(
        _pool_kernel,
        out_shape=(jax.ShapeDtypeStruct((2, pack * B, pack * C), jnp.float32),
                   jax.ShapeDtypeStruct((2, B, pack * C), jnp.float32)),
        grid=(2, nt_half),
        in_specs=[
            pl.BlockSpec((tnp, pack * C), lambda i, j: (i * nt_half + j, 0)),  # x
            pl.BlockSpec((tnp, pack), lambda i, j: (i * nt_half + j, 0)),      # bid
            pl.BlockSpec((pack * C, pack * H), lambda i, j: (0, 0)),           # W1 bd
            pl.BlockSpec((1, pack * H), lambda i, j: (0, 0)),                  # b1
            pl.BlockSpec((pack * H, pack * C), lambda i, j: (0, 0)),           # W2 bd
            pl.BlockSpec((1, pack * C), lambda i, j: (0, 0)),                  # b2
            pl.BlockSpec((pack, pack * C), lambda i, j: (0, 0)),               # expand
            pl.BlockSpec((pack, pack * B), lambda i, j: (0, 0)),               # rmat
            pl.BlockSpec((1, pack * B), lambda i, j: (0, 0)),                  # lb
        ],
        out_specs=(
            pl.BlockSpec((1, pack * B, pack * C), lambda i, j: (i, 0, 0)),
            pl.BlockSpec((1, B, pack * C), lambda i, j: (i, 0, 0)),
        ),
        compiler_params=pltpu.CompilerParams(
            dimension_semantics=("parallel", "arbitrary")),
    )(x_packed, bid_packed, w1_bd, b1_t, w2_bd, b2_t, expand, rmat, lb)

    # ---------------- tiny finalize in the wrapper (cheap XLA ops) ----------------
    t_tot = jnp.sum(sum_part, axis=0)                             # [pack*B, pack*C]
    s = jnp.zeros((B, C), jnp.float32)
    for p in range(pack):                                         # static, tiny
        s = s + t_tot[p * B:(p + 1) * B, p * C:(p + 1) * C]
    m = jnp.max(max_part, axis=0).reshape(B, pack, C).max(axis=1)  # [B, C]
    gate = jax.nn.sigmoid(m + s * inv_cnt)                        # [B, C]
    gmat = jnp.kron(eye_p, gate)                                  # [pack*B, pack*C]

    # ---------------- pass 2: lane-dense gate apply ----------------
    out_packed = pl.pallas_call(
        _apply_kernel,
        out_shape=jax.ShapeDtypeStruct((n_pad // pack, pack * C), x.dtype),
        grid=(nt,),
        in_specs=[
            pl.BlockSpec((tnp, pack), lambda i: (i, 0)),           # bid tile
            pl.BlockSpec((pack, pack * B), lambda i: (0, 0)),      # rmat (resident)
            pl.BlockSpec((1, pack * B), lambda i: (0, 0)),         # lb   (resident)
            pl.BlockSpec((pack * B, pack * C), lambda i: (0, 0)),  # gate (resident)
            pl.BlockSpec((tnp, pack * C), lambda i: (i, 0)),       # x tile
        ],
        out_specs=pl.BlockSpec((tnp, pack * C), lambda i: (i, 0)),
        compiler_params=pltpu.CompilerParams(dimension_semantics=("parallel",)),
    )(bid_packed, rmat, lb, gmat, x_packed)

    return out_packed.reshape(n_pad, C)[:N, :]


def attention_ref(x, batch, w1, b1, w2, b2, num_batches):
    """Pure-JAX reference mirroring the PyTorch semantics."""
    q = jnp.maximum(x @ w1 + b1, 0.0) @ w2 + b2
    mx = jax.ops.segment_max(q, batch, num_segments=num_batches)
    sm = jax.ops.segment_sum(q, batch, num_segments=num_batches)
    cnt = jax.ops.segment_sum(jnp.ones((x.shape[0], 1), x.dtype), batch,
                              num_segments=num_batches)
    s = jax.nn.sigmoid(mx + sm / cnt)
    return s[batch] * x


if __name__ == "__main__":
    # Shapes consistent with the module: in_dim=32, reduction_ratio=16 -> hidden=2.
    # N=200 with tile_n=128 -> 2 N-tiles (one per "core half"), exercising the
    # parallel split, the resident accumulators, and the padding path.
    N, C, R, B = 200, 32, 16, 2
    H = C // R

    key = jax.random.PRNGKey(0)
    kx, kw1, kb1, kw2, kb2 = jax.random.split(key, 5)

    x = jax.random.normal(kx, (N, C), dtype=jnp.float32)
    # sorted (torch_geometric convention) but unequal batch sizes
    batch = jnp.concatenate([jnp.zeros((120,), jnp.int32),
                             jnp.ones((N - 120,), jnp.int32)])

    # Deterministic Linear params (PyTorch default U(-1/sqrt(fan_in), 1/sqrt(fan_in))),
    # stored pre-transposed as [in, out].
    lim1 = 1.0 / np.sqrt(C)
    lim2 = 1.0 / np.sqrt(H)
    w1 = jax.random.uniform(kw1, (C, H), jnp.float32, -lim1, lim1)
    b1 = jax.random.uniform(kb1, (H,), jnp.float32, -lim1, lim1)
    w2 = jax.random.uniform(kw2, (H, C), jnp.float32, -lim2, lim2)
    b2 = jax.random.uniform(kb2, (C,), jnp.float32, -lim2, lim2)

    out = attention_forward(x, batch, w1, b1, w2, b2, B, tile_n=128)
    out = jax.block_until_ready(out)

    ref = attention_ref(x, batch, w1, b1, w2, b2, B)
    np.testing.assert_allclose(np.asarray(out), np.asarray(ref), rtol=1e-4, atol=1e-4)

    print("KERNEL_OK")
</pallas_src>

<mosaic_0001>
module attributes {stable_mosaic.version = 11 : i64} {
  func.func @_pool_kernel(%arg0: i32, %arg1: i32, %arg2: memref<32x128xf32, #tpu.memory_space<vmem>>, %arg3: memref<32x4xf32, #tpu.memory_space<vmem>>, %arg4: memref<128x8xf32, #tpu.memory_space<vmem>>, %arg5: memref<1x8xf32, #tpu.memory_space<vmem>>, %arg6: memref<8x128xf32, #tpu.memory_space<vmem>>, %arg7: memref<1x128xf32, #tpu.memory_space<vmem>>, %arg8: memref<4x128xf32, #tpu.memory_space<vmem>>, %arg9: memref<4x8xf32, #tpu.memory_space<vmem>>, %arg10: memref<1x8xf32, #tpu.memory_space<vmem>>, %arg11: memref<1x8x128xf32, #tpu.memory_space<vmem>>, %arg12: memref<1x2x128xf32, #tpu.memory_space<vmem>>) attributes {dimension_semantics = [#tpu.dimension_semantics<parallel>, #tpu.dimension_semantics<arbitrary>], iteration_bounds = array<i64: 2, 1>, scalar_prefetch = 0 : i64, scratch_operands = 0 : i64, tpu.core_type = #tpu.core_type<tc>, window_params = [{transform_indices = @transform_0, window_bounds = array<i64: 32, 128>}, {transform_indices = @transform_1, window_bounds = array<i64: 32, 4>}, {pipeline_mode = #tpu.pipeline_mode<synchronous>, transform_indices = @transform_2, window_bounds = array<i64: 128, 8>}, {pipeline_mode = #tpu.pipeline_mode<synchronous>, transform_indices = @transform_3, window_bounds = array<i64: 1, 8>}, {pipeline_mode = #tpu.pipeline_mode<synchronous>, transform_indices = @transform_4, window_bounds = array<i64: 8, 128>}, {pipeline_mode = #tpu.pipeline_mode<synchronous>, transform_indices = @transform_5, window_bounds = array<i64: 1, 128>}, {pipeline_mode = #tpu.pipeline_mode<synchronous>, transform_indices = @transform_6, window_bounds = array<i64: 4, 128>}, {pipeline_mode = #tpu.pipeline_mode<synchronous>, transform_indices = @transform_7, window_bounds = array<i64: 4, 8>}, {pipeline_mode = #tpu.pipeline_mode<synchronous>, transform_indices = @transform_8, window_bounds = array<i64: 1, 8>}, {transform_indices = @transform_9, window_bounds = array<i64: 1, 8, 128>}, {transform_indices = @transform_10, window_bounds = array<i64: 1, 2, 128>}]} {
    %c0_i32 = arith.constant 0 : i32
    %0 = arith.cmpi eq, %arg1, %c0_i32 : i32
    %1 = arith.extui %0 : i1 to i32
    %c0_i32_0 = arith.constant 0 : i32
    %2 = arith.cmpi ne, %1, %c0_i32_0 : i32
    scf.if %2 {
      %cst_41 = arith.constant 0.000000e+00 : f32
      %48 = vector.broadcast %cst_41 : f32 to vector<1x8x128xf32>
      %c0_42 = arith.constant 0 : index
      %c0_43 = arith.constant 0 : index
      %c0_44 = arith.constant 0 : index
      %49 = vector.load %arg11[%c0_42, %c0_43, %c0_44] : memref<1x8x128xf32, #tpu.memory_space<vmem>>, vector<1x8x128xf32>
      tpu.vector_store %arg11[%c0_42, %c0_43, %c0_44], %48 {strides = array<i32>} : memref<1x8x128xf32, #tpu.memory_space<vmem>>, vector<1x8x128xf32>,
      %cst_45 = arith.constant -3.000000e+38 : f32
      %50 = vector.broadcast %cst_45 : f32 to vector<1x2x128xf32>
      %c0_46 = arith.constant 0 : index
      %c0_47 = arith.constant 0 : index
      %c0_48 = arith.constant 0 : index
      %51 = vector.load %arg12[%c0_46, %c0_47, %c0_48] : memref<1x2x128xf32, #tpu.memory_space<vmem>>, vector<1x2x128xf32>
      tpu.vector_store %arg12[%c0_46, %c0_47, %c0_48], %50 {strides = array<i32>} : memref<1x2x128xf32, #tpu.memory_space<vmem>>, vector<1x2x128xf32>,
    } else {
    }
    %c0 = arith.constant 0 : index
    %c0_1 = arith.constant 0 : index
    %3 = vector.load %arg2[%c0, %c0_1] : memref<32x128xf32, #tpu.memory_space<vmem>>, vector<32x128xf32>
    %c0_2 = arith.constant 0 : index
    %c0_3 = arith.constant 0 : index
    %4 = vector.load %arg3[%c0_2, %c0_3] : memref<32x4xf32, #tpu.memory_space<vmem>>, vector<32x4xf32>
    %c0_4 = arith.constant 0 : index
    %c0_5 = arith.constant 0 : index
    %5 = vector.load %arg4[%c0_4, %c0_5] : memref<128x8xf32, #tpu.memory_space<vmem>>, vector<128x8xf32>
    %cst = arith.constant dense<0.000000e+00> : vector<32x8xf32>
    %6 = tpu.matmul %3, %5, %cst {dimension_numbers = #tpu.dot_dimension_numbers<[1], [0], [0], [1], [0, 0, 1, 1], [], []>} : vector<32x128xf32>, vector<128x8xf32>, vector<32x8xf32> -> vector<32x8xf32>
    %c0_6 = arith.constant 0 : index
    %c0_7 = arith.constant 0 : index
    %7 = vector.load %arg5[%c0_6, %c0_7] : memref<1x8xf32, #tpu.memory_space<vmem>>, vector<1x8xf32>
    %8 = vector.broadcast %7 : vector<1x8xf32> to vector<32x8xf32>
    %9 = arith.addf %6, %8 : vector<32x8xf32>
    %cst_8 = arith.constant 0.000000e+00 : f32
    %10 = vector.broadcast %cst_8 : f32 to vector<32x8xf32>
    %11 = arith.maximumf %9, %10 : vector<32x8xf32>
    %c0_9 = arith.constant 0 : index
    %c0_10 = arith.constant 0 : index
    %12 = vector.load %arg6[%c0_9, %c0_10] : memref<8x128xf32, #tpu.memory_space<vmem>>, vector<8x128xf32>
    %cst_11 = arith.constant dense<0.000000e+00> : vector<32x128xf32>
    %13 = tpu.matmul %11, %12, %cst_11 {dimension_numbers = #tpu.dot_dimension_numbers<[1], [0], [0], [1], [0, 0, 1, 1], [], []>} : vector<32x8xf32>, vector<8x128xf32>, vector<32x128xf32> -> vector<32x128xf32>
    %c0_12 = arith.constant 0 : index
    %c0_13 = arith.constant 0 : index
    %14 = vector.load %arg7[%c0_12, %c0_13] : memref<1x128xf32, #tpu.memory_space<vmem>>, vector<1x128xf32>
    %15 = vector.broadcast %14 : vector<1x128xf32> to vector<32x128xf32>
    %16 = arith.addf %13, %15 : vector<32x128xf32>
    %c0_14 = arith.constant 0 : index
    %c0_15 = arith.constant 0 : index
    %17 = vector.load %arg9[%c0_14, %c0_15] : memref<4x8xf32, #tpu.memory_space<vmem>>, vector<4x8xf32>
    %cst_16 = arith.constant dense<0.000000e+00> : vector<32x8xf32>
    %18 = tpu.matmul %4, %17, %cst_16 {dimension_numbers = #tpu.dot_dimension_numbers<[1], [0], [0], [1], [0, 0, 1, 1], [], []>} : vector<32x4xf32>, vector<4x8xf32>, vector<32x8xf32> -> vector<32x8xf32>
    %c0_17 = arith.constant 0 : index
    %c0_18 = arith.constant 0 : index
    %19 = vector.load %arg10[%c0_17, %c0_18] : memref<1x8xf32, #tpu.memory_space<vmem>>, vector<1x8xf32>
    %20 = vector.broadcast %19 : vector<1x8xf32> to vector<32x8xf32>
    %21 = arith.cmpf oeq, %18, %20 : vector<32x8xf32>
    %22 = arith.extui %21 : vector<32x8xi1> to vector<32x8xi32>
    %23 = arith.sitofp %22 : vector<32x8xi32> to vector<32x8xf32>
    %cst_19 = arith.constant dense<0.000000e+00> : vector<8x128xf32>
    %24 = tpu.matmul %23, %16, %cst_19 {dimension_numbers = #tpu.dot_dimension_numbers<[0], [0], [1], [1], [0, 1, 1, 1], [], []>} : vector<32x8xf32>, vector<32x128xf32>, vector<8x128xf32> -> vector<8x128xf32>
    %c0_20 = arith.constant 0 : index
    %c0_21 = arith.constant 0 : index
    %c0_22 = arith.constant 0 : index
    %25 = vector.load %arg11[%c0_20, %c0_21, %c0_22] : memref<1x8x128xf32, #tpu.memory_space<vmem>>, vector<1x8x128xf32>
    %26 = vector.shape_cast %24 : vector<8x128xf32> to vector<1x8x128xf32>
    %27 = arith.addf %25, %26 : vector<1x8x128xf32>
    %c0_23 = arith.constant 0 : index
    %c0_24 = arith.constant 0 : index
    %c0_25 = arith.constant 0 : index
    %28 = vector.load %arg11[%c0_23, %c0_24, %c0_25] : memref<1x8x128xf32, #tpu.memory_space<vmem>>, vector<1x8x128xf32>
    tpu.vector_store %arg11[%c0_23, %c0_24, %c0_25], %27 {strides = array<i32>} : memref<1x8x128xf32, #tpu.memory_space<vmem>>, vector<1x8x128xf32>,
    %c0_26 = arith.constant 0 : index
    %c0_27 = arith.constant 0 : index
    %29 = vector.load %arg8[%c0_26, %c0_27] : memref<4x128xf32, #tpu.memory_space<vmem>>, vector<4x128xf32>
    %cst_28 = arith.constant dense<0.000000e+00> : vector<32x128xf32>
    %30 = tpu.matmul %4, %29, %cst_28 {dimension_numbers = #tpu.dot_dimension_numbers<[1], [0], [0], [1], [0, 0, 1, 1], [], []>} : vector<32x4xf32>, vector<4x128xf32>, vector<32x128xf32> -> vector<32x128xf32>
    %cst_29 = arith.constant 0.000000e+00 : f32
    %31 = vector.broadcast %cst_29 : f32 to vector<32x128xf32>
    %32 = arith.cmpf oeq, %30, %31 : vector<32x128xf32>
    %cst_30 = arith.constant -3.000000e+38 : f32
    %33 = vector.broadcast %cst_30 : f32 to vector<32x128xf32>
    %34 = arith.select %32, %16, %33 : vector<32x128xi1>, vector<32x128xf32>
    %cst_31 = arith.constant dense<0xFF800000> : vector<128xf32>
    %35 = vector.multi_reduction <maximumf>, %34, %cst_31 [0] : vector<32x128xf32> to vector<128xf32>
    %36 = vector.shape_cast %35 : vector<128xf32> to vector<1x128xf32>
    %cst_32 = arith.constant 1.000000e+00 : f32
    %37 = vector.broadcast %cst_32 : f32 to vector<32x128xf32>
    %38 = arith.cmpf oeq, %30, %37 : vector<32x128xf32>
    %cst_33 = arith.constant -3.000000e+38 : f32
    %39 = vector.broadcast %cst_33 : f32 to vector<32x128xf32>
    %40 = arith.select %38, %16, %39 : vector<32x128xi1>, vector<32x128xf32>
    %cst_34 = arith.constant dense<0xFF800000> : vector<128xf32>
    %41 = vector.multi_reduction <maximumf>, %40, %cst_34 [0] : vector<32x128xf32> to vector<128xf32>
    %42 = vector.shape_cast %41 : vector<128xf32> to vector<1x128xf32>
    %43 = tpu.concatenate %36, %42 in 0 : vector<1x128xf32>, vector<1x128xf32> -> vector<2x128xf32>
    %c0_35 = arith.constant 0 : index
    %c0_36 = arith.constant 0 : index
    %c0_37 = arith.constant 0 : index
    %44 = vector.load %arg12[%c0_35, %c0_36, %c0_37] : memref<1x2x128xf32, #tpu.memory_space<vmem>>, vector<1x2x128xf32>
    %45 = vector.shape_cast %43 : vector<2x128xf32> to vector<1x2x128xf32>
    %46 = arith.maximumf %44, %45 : vector<1x2x128xf32>
    %c0_38 = arith.constant 0 : index
    %c0_39 = arith.constant 0 : index
    %c0_40 = arith.constant 0 : index
    %47 = vector.load %arg12[%c0_38, %c0_39, %c0_40] : memref<1x2x128xf32, #tpu.memory_space<vmem>>, vector<1x2x128xf32>
    tpu.vector_store %arg12[%c0_38, %c0_39, %c0_40], %46 {strides = array<i32>} : memref<1x2x128xf32, #tpu.memory_space<vmem>>, vector<1x2x128xf32>,
    return
  }
  func.func @transform_0(%arg0: i32, %arg1: i32) -> (i32, i32) {
    %c1_i32 = arith.constant 1 : i32
    %0 = arith.muli %arg0, %c1_i32 : i32
    %1 = arith.addi %0, %arg1 : i32
    %c0_i32 = arith.constant 0 : i32
    %c0_i32_0 = arith.constant 0 : i32
    return %1, %c0_i32 : i32, i32
  }
  func.func @transform_1(%arg0: i32, %arg1: i32) -> (i32, i32) {
    %c1_i32 = arith.constant 1 : i32
    %0 = arith.muli %arg0, %c1_i32 : i32
    %1 = arith.addi %0, %arg1 : i32
    %c0_i32 = arith.constant 0 : i32
    %c0_i32_0 = arith.constant 0 : i32
    return %1, %c0_i32 : i32, i32
  }
  func.func @transform_2(%arg0: i32, %arg1: i32) -> (i32, i32) {
    %c0_i32 = arith.constant 0 : i32
    %c0_i32_0 = arith.constant 0 : i32
    %c0_i32_1 = arith.constant 0 : i32
    return %c0_i32, %c0_i32_0 : i32, i32
  }
  func.func @transform_3(%arg0: i32, %arg1: i32) -> (i32, i32) {
    %c0_i32 = arith.constant 0 : i32
    %c0_i32_0 = arith.constant 0 : i32
    %c0_i32_1 = arith.constant 0 : i32
    return %c0_i32, %c0_i32_0 : i32, i32
  }
  func.func @transform_4(%arg0: i32, %arg1: i32) -> (i32, i32) {
    %c0_i32 = arith.constant 0 : i32
    %c0_i32_0 = arith.constant 0 : i32
    %c0_i32_1 = arith.constant 0 : i32
    return %c0_i32, %c0_i32_0 : i32, i32
  }
  func.func @transform_5(%arg0: i32, %arg1: i32) -> (i32, i32) {
    %c0_i32 = arith.constant 0 : i32
    %c0_i32_0 = arith.constant 0 : i32
    %c0_i32_1 = arith.constant 0 : i32
    return %c0_i32, %c0_i32_0 : i32, i32
  }
  func.func @transform_6(%arg0: i32, %arg1: i32) -> (i32, i32) {
    %c0_i32 = arith.constant 0 : i32
    %c0_i32_0 = arith.constant 0 : i32
    %c0_i32_1 = arith.constant 0 : i32
    return %c0_i32, %c0_i32_0 : i32, i32
  }
  func.func @transform_7(%arg0: i32, %arg1: i32) -> (i32, i32) {
    %c0_i32 = arith.constant 0 : i32
    %c0_i32_0 = arith.constant 0 : i32
    %c0_i32_1 = arith.constant 0 : i32
    return %c0_i32, %c0_i32_0 : i32, i32
  }
  func.func @transform_8(%arg0: i32, %arg1: i32) -> (i32, i32) {
    %c0_i32 = arith.constant 0 : i32
    %c0_i32_0 = arith.constant 0 : i32
    %c0_i32_1 = arith.constant 0 : i32
    return %c0_i32, %c0_i32_0 : i32, i32
  }
  func.func @transform_9(%arg0: i32, %arg1: i32) -> (i32, i32, i32) {
    %c0_i32 = arith.constant 0 : i32
    %c0_i32_0 = arith.constant 0 : i32
    %c0_i32_1 = arith.constant 0 : i32
    return %arg0, %c0_i32, %c0_i32_0 : i32, i32, i32
  }
  func.func @transform_10(%arg0: i32, %arg1: i32) -> (i32, i32, i32) {
    %c0_i32 = arith.constant 0 : i32
    %c0_i32_0 = arith.constant 0 : i32
    %c0_i32_1 = arith.constant 0 : i32
    return %arg0, %c0_i32, %c0_i32_0 : i32, i32, i32
  }
}

</mosaic_0001>

<bundles_post_ra>
// kernel: tpu_custom_call.1
= control target key start
LH: loop header
LB: loop body
LE: loop exit
PB: predicated region body
PF: predicated region fallthrough
CT: control target
= control target key end

     0   :  { %s1383_s0 = inlined_call_operand.vmem [shape: f32[64,128], index: 0, kind: input, shape index: {}]   ;;  %s1384_s1 = inlined_call_operand.vmem [shape: f32[64,4], index: 1, kind: input, shape index: {}]   ;;  %s1385_s2 = inlined_call_operand.vmem [shape: f32[128,8], index: 2, kind: input, shape index: {}]   ;;  %s1386_s3 = inlined_call_operand.vmem [shape: f32[1,8], index: 3, kind: input, shape index: {}]   ;;  %s1387_s4 = inlined_call_operand.vmem [shape: f32[8,128], index: 4, kind: input, shape index: {}]   ;;  %s1388_s5 = inlined_call_operand.vmem [shape: f32[1,128], index: 5, kind: input, shape index: {}]   ;;  %s1389_s6 = inlined_call_operand.vmem [shape: f32[4,128], index: 6, kind: input, shape index: {}]   ;;  %s1390_s7 = inlined_call_operand.vmem [shape: f32[4,8], index: 7, kind: input, shape index: {}]   ;;  %s1391_s8 = inlined_call_operand.vmem [shape: f32[1,8], index: 8, kind: input, shape index: {}]   ;;  %s1392_s9 = inlined_call_operand.hbm [shape: f32[2,8,128], index: 9, kind: output, shape index: {0}]   ;;  %s1393_s10 = inlined_call_operand.hbm [shape: f32[2,2,128], index: 10, kind: output, shape index: {1}]  }
   0x1   :  { %1395 = sst [smem:[#allocation8_spill]] %s1383_s0 }
   0x2   :  { %1396 = sst [smem:[#allocation9_spill]] %s1384_s1 }
   0x3   :  { %1397 = sst [smem:[#allocation10_spill]] %s1385_s2 }
   0x4   :  { %1398 = sst [smem:[#allocation11_spill]] %s1390_s7 }
   0x5   :  { %16 = vsyncpa [#allocation3], 0 }
   0x6   :  { %18 = vsyncpa [#allocation3 + $0x1], 0 }
   0x7   :  { %19 = vsyncpa [#allocation5], 0 }
   0x8   :  { %21 = vsyncpa [#allocation5 + $0x1], 0  ;;  %s1144_s13 = smov 0   ;;  %s1146_s14 = smov 0  }
   0x9   :  { %s1148_s15 = smov 0   ;;  %s1150_s16 = smov 0  }
   0xa   :  { %s1152_s17 = smov 0   ;;  %s1154_s18 = smov 0  }
   0xb LB: > { %s874_s19 = sadd.s32 4294967295, %s1085_s18   ;;  %s875_s20 = sadd.s32 4294967294, %s1085_s18   ;;  %s1085_s18 = sphi %s1154_s18, %s27_s18   ;;  %s1081_s17 = sphi %s1152_s17, %s1410_s17   ;;  %s1077_s16 = sphi %s1150_s16, %s1409_s16   ;;  %s1073_s15 = sphi %s1148_s15, %s1408_s15   ;;  %s1069_s14 = sphi %s1146_s14, %s1407_s14   ;;  %s1065_s13 = sphi %s1144_s13, %s1406_s13  }
   0xc   : > { %s39_s21 = sadd.s32 1, %s1081_s17  ;;  %s249_s22 = sadd.s32 1, %s1073_s15 }
   0xd   : > { %p41_p0 = scmp.ge.s32.totalorder %s39_s21, 2  ;;  %p259_p1 = scmp.ne.s32.totalorder %s1073_s15, %s1069_s14 }
   0xe   : > { %p260_p2 = scmp.eq.s32.totalorder %s874_s19, 1  ;;  %p265_p3 = scmp.ne.s32.totalorder %s1069_s14, %s1065_s13 }
   0xf   : > { %s1412_s21 = smov (%p41_p0, %s39_s21), 0  ;;  %p266_p5 = scmp.eq.s32.totalorder %s875_s20, 1 }
  0x10   : > { %p1184_p4 = por %p260_p2, %p259_p1  ;;  %s246_s24 = ssub.s32 %s1081_s17, %s1412_s21 }
  0x11   : > { %p878_p6 = scmp.ge.s32.totalorder %s1085_s18, 1  ;;  %p247_p7 = scmp.eq.s32.totalorder %s246_s24, 0 }
  0x12   : > { %p1191_p8 = por %p266_p5, %p265_p3  ;;  %p353_p9 = scmp.lt.s32.totalorder %s1085_s18, 3 }
  0x13   : > { %s1197_s26 = scalar_select %p247_p7, %s1073_s15, %s249_s22  }
  0x14   : > { %p354_p10 = pnand %p878_p6, %p353_p9 }
  0x15   : > { %s1401_s2 = sld [smem:[#allocation10_spill]] (!%p354_p10)  ;;  %s881_s11 = sshll.u32 (!%p354_p10), %s1077_s16, 2 }
  0x16   : > { %357 = sbr.rel (%p354_p10) target bundleno = 536 (0x218), region = 56  ;;  %p405_p11 = scmp.lt.s32.totalorder (!%p354_p10), %s881_s11, 7 }
  0x17   : > { %s1402_s7 = sld [smem:[#allocation11_spill]] (!%p354_p10)  ;;  %s1319_s19 = sand.u32 (!%p354_p10), 1, %s1069_s14  }
  0x18   : > { %s1403_s1 = sld [smem:[#allocation9_spill]] (!%p354_p10)  ;;  %s728_s29 = scalar_lea.sflag (!%p354_p10), [#allocation3], %s1319_s19 }
  0x19   : > { %s1405_s0 = sld [smem:[#allocation8_spill]] (!%p354_p10) }
  0x1b   : > { %v448_v0 = vld [vmem:[%s1401_s2 + $0x78] sm:$0xff]  ;;  %v447_v1 = vld [vmem:[%s1401_s2 + $0x70] sm:$0xff]  ;;  %vm547_vm0 = vcmask 1043456   ;;  %v446_v2 = vld [vmem:[%s1401_s2 + $0x68] sm:$0xff]  ;;  %s1414_s11 = smov (!%p405_p11, %s881_s11), 7  ;;  %vm534_vm1 = vcmask 31744  }
  0x1c   : > { %453 = vmatpush.msra.mxu0 %v448_v0  ;;  %v445_v4 = vld [vmem:[%s1401_s2 + $0x60] sm:$0xff]  ;;  %s1394_s28 = sshll.u32 %s1414_s11, 3  ;;  %v444_v5 = vld [vmem:[%s1401_s2 + $0x58] sm:$0xff]  ;;  %v443_v7 = vld [vmem:[%s1401_s2 + $0x50] sm:$0xff]  ;;  %s1404_s30 = sshll.u32 %s1414_s11, 3  ;;  %v1087_v28 = vmov 0.0  }
  0x1d   : > { %v533_v3 = vld [vmem:[%s1402_s7] sm:$0xf]  ;;  %v442_v8 = vld [vmem:[%s1401_s2 + $0x48] sm:$0xff]  ;;  %v440_v11 = vld [vmem:[%s1401_s2 + $0x38] sm:$0xff]  ;;  %vm491_vm5 = vcmask 64512   ;;  %vm628_vm7 = vcmask 261120  }
  0x1e   : > { %454 = vmatpush.msra.mxu0 %v447_v1  ;;  %889 = vmatpush.msk.msra.mxu2 %vm547_vm0, %v533_v3  ;;  %s1227_s20 = scalar_lea.vmem %s1403_s1, %s1394_s28  ;;  %v441_v9 = vld [vmem:[%s1401_s2 + $0x40] sm:$0xff]  ;;  %v439_v12 = vld [vmem:[%s1401_s2 + $0x30] sm:$0xff]  ;;  %v438_v13 = vld [vmem:[%s1401_s2 + $0x28] sm:$0xff]  ;;  %s906_s28 = sshll.u32 %s1077_s16, 3 }
  0x1f   : > { %v1230_v6 = vld [vmem:[%s1227_s20] sm:$0xff]  ;;  %v1244_v10 = vld [vmem:[%s1227_s20 + $0x8] sm:$0xff]  ;;  %v1261_v15 = vld [vmem:[%s1227_s20 + $0x10] sm:$0xff]  ;;  %s408_s7 = scalar_lea.vmem %s1405_s0, %s1404_s30  ;;  %s879_s1 = sshll.u32 %s1319_s19, 3 }
  0x20   : > { %455 = vmatpush.msra.mxu0 %v446_v2  ;;  %890 = vmatmul.msk.f32.vlgmr.msra.gmra.mxu2 %vm534_vm1, %v1230_v6  ;;  %v437_v14 = vld [vmem:[%s1401_s2 + $0x20] sm:$0xff]  ;;  %v436_v16 = vld [vmem:[%s1401_s2 + $0x18] sm:$0xff]  ;;  %v435_v17 = vld [vmem:[%s1401_s2 + $0x10] sm:$0xff]  ;;  %s743_s24 = scalar_lea.hbm %s1392_s9, %s906_s28  ;;  %s995_s11 = scalar_lea.hbm %s1392_s9, 16 }
  0x21   : > { %v434_v18 = vld [vmem:[%s1401_s2 + $0x8] sm:$0xff]  ;;  %v433_v19 = vld [vmem:[%s1401_s2] sm:$0xff]  ;;  %v1283_v21 = vld [vmem:[%s1227_s20 + $0x18] sm:$0xff]  ;;  %s747_s27 = sshll.u32 %s743_s24, 4  ;;  %s748_s27 = int_to_ptr.hbm [resolvable:$true] %s747_s27 }
  0x22   : > { %456 = vmatpush.msra.mxu0 %v445_v4  ;;  %v425_v20 = vld [vmem:[%s408_s7] sm:$0xff]  ;;  %v426_v22 = vld [vmem:[%s408_s7 + $0x8] sm:$0xff]  ;;  %v427_v23 = vld [vmem:[%s408_s7 + $0x10] sm:$0xff]  ;;  %s989_s30 = sshra.s32 %s748_s27, 4  ;;  %s990_s30 = int_to_ptr.hbm [resolvable:$true] %s989_s30 }
  0x23   : > { %v428_v24 = vld [vmem:[%s408_s7 + $0x18] sm:$0xff]  ;;  %v486_v25 = vld [vmem:[%s1387_s4] sm:$0xff]  ;;  %s395_s7 = scalar_lea.vmem [#allocation2], %s879_s1  ;;  %s991_s12 = scalar_lea.hbm %s990_s30, 8 }
  0x24   : > { %457 = vmatpush.msra.mxu0 %v444_v5  ;;  %519 = vmatpush.msra.mxu1 %v486_v25  ;;  %v972_v26 = vld [vmem:[%s1391_s8] ss:$0 sm:$0xff]  ;;  %s745_s20 = sshll.u32 %s395_s7, 4  ;;  %p992_p12 = scmp.ne.s32.totalorder %s990_s30, %s991_s12  ;;  %s746_s20 = int_to_ptr.vmem [resolvable:$true] %s745_s20 }
  0x25   : > { %v973_v32 = vld [vmem:[%s1386_s3] ss:$0 sm:$0xff]  ;;  %p996_p1 = scmp.lt.s32.totalorder %s990_s30, %s1392_s9  ;;  %p997_p2 = scmp.lt.s32.totalorder %s995_s11, %s991_s12 }
  0x26   : > { %458 = vmatpush.msra.mxu0 %v443_v7  ;;  %v974_v52 = vld [vmem:[%s1388_s5] ss:$0 sm:$0xff]  ;;  %p993_p13 = pnand %p992_p12, %p1184_p4 }
  0x27   : > { %v655_v59 = vld [vmem:[%s1389_s6] sm:$0xf]  ;;  %p998_p3 = por %p997_p2, %p996_p1 }
  0x28   : > { %459 = vmatpush.msra.mxu0 %v442_v8  ;;  %891 = vmatmul.msk.f32.gmra.mxu2 %vm534_vm1, %v1244_v10  ;;  %p994_p0 = pneg %p993_p13 }
  0x2a   : > { %460 = vmatpush.msra.mxu0 %v441_v9  ;;  %p999_p5 = pnand %p998_p3, %p994_p0 }
  0x2c   : > { %461 = vmatpush.msra.mxu0 %v440_v11 }
  0x2e   : > { %462 = vmatpush.msra.mxu0 %v439_v12 }
  0x30   : > { %463 = vmatpush.msra.mxu0 %v438_v13  ;;  %892 = vmatmul.msk.f32.gmra.mxu2 %vm534_vm1, %v1261_v15 }
  0x32   : > { %464 = vmatpush.msra.mxu0 %v437_v14 }
  0x34   : > { %465 = vmatpush.msra.mxu0 %v436_v16 }
  0x36   : > { %466 = vmatpush.msra.mxu0 %v435_v17 }
  0x38   : > { %467 = vmatpush.msra.mxu0 %v434_v18  ;;  %893 = vmatmul.msk.f32.gmra.mxu2 %vm534_vm1, %v1283_v21 }
  0x3a   : > { %468 = vmatpush.msra.mxu0 %v433_v19 }
  0x3b   : > { %469 = vmatmul.f32.vlgmr.msra.gmra.mxu0 %v425_v20 }
  0x43   : > { %472 = vmatmul.f32.gmra.mxu0 %v426_v22 }
  0x4b   : > { %475 = vmatmul.f32.gmra.mxu0 %v427_v23 }
  0x53   : > { %478 = vmatmul.f32.gmra.mxu0 %v428_v24 }
  0xa3   : > { %v568_v27 = vpop.f32.mrf.mxu2 }
  0xa4   : > { %vm584_vm2 = vcmp.eq.f32.partialorder %v568_v27, %v972_v26 }
  0xa5   : > { %v894_v29 = vsel %vm584_vm2, 1.0, %v1087_v28 }
  0xa6   : > { %596 = vxpose.xlu0.b32.start [1/4] (short) (narrow) %v894_v29, 8 }
  0xab   : > { %v571_v30 = vpop.f32.mrf.mxu2 }
  0xac   : > { %vm585_vm3 = vcmp.eq.f32.partialorder %v571_v30, %v972_v26 }
  0xad   : > { %v895_v31 = vsel %vm585_vm3, 1.0, %v1087_v28 }
  0xae   : > { %597 = vxpose.xlu0.b32.cont [2/4] (short) (narrow) %v895_v31, 8 }
  0xb3   : > { %v574_v33 = vpop.f32.mrf.mxu2 }
  0xb4   : > { %vm586_vm4 = vcmp.eq.f32.partialorder %v574_v33, %v972_v26 }
  0xb5   : > { %v896_v35 = vsel %vm586_vm4, 1.0, %v1087_v28 }
  0xb6   : > { %598 = vxpose.xlu0.b32.cont [3/4] (short) (narrow) %v896_v35, 8 }
  0xb8   : > { %v470_v34 = vpop.f32.mrf.mxu0 }
  0xb9   : > { %v471_v36 = vadd.f32 %v973_v32, %v470_v34 }
  0xbb   : > { %v482_v37 = vmax.f32 %v471_v36, 0.0  ;;  %v577_v38 = vpop.f32.mrf.mxu2 }
  0xbc   : > { %vm587_vm6 = vcmp.eq.f32.partialorder %v577_v38, %v972_v26 }
  0xbd   : > { %885 = vmatmul.msk.f32.vlgmr.msra.gmra.mxu1 %vm491_vm5, %v482_v37  ;;  %v897_v40 = vsel %vm587_vm6, 1.0, %v1087_v28 }
  0xbe   : > { %599 = vxpose.xlu0.b32.end [4/4] (short) (narrow) %v897_v40, 8 }
  0xc0   : > { %v473_v39 = vpop.f32.mrf.mxu0 }
  0xc1   : > { %v474_v41 = vadd.f32 %v973_v32, %v473_v39 }
  0xc3   : > { %v483_v42 = vmax.f32 %v474_v41, 0.0 }
  0xc5   : > { %886 = vmatmul.msk.f32.gmra.mxu1 %vm491_vm5, %v483_v42 }
  0xc8   : > { %v476_v43 = vpop.f32.mrf.mxu0 }
  0xc9   : > { %v477_v44 = vadd.f32 %v973_v32, %v476_v43 }
  0xcb   : > { %v484_v45 = vmax.f32 %v477_v44, 0.0 }
  0xcd   : > { %887 = vmatmul.msk.f32.gmra.mxu1 %vm491_vm5, %v484_v45 }
  0xd0   : > { %v479_v46 = vpop.f32.mrf.mxu0 }
  0xd1   : > { %v480_v47 = vadd.f32 %v973_v32, %v479_v46 }
  0xd3   : > { %v485_v48 = vmax.f32 %v480_v47, 0.0 }
  0xd5   : > { %888 = vmatmul.msk.f32.gmra.mxu1 %vm491_vm5, %v485_v48 }
 0x13a   : > { %v521_v49 = vpop.f32.mrf.mxu1 }
 0x13b   : > { %v522_v57 = vadd.f32 %v974_v52, %v521_v49 }
 0x142   : > { %v524_v50 = vpop.f32.mrf.mxu1 }
 0x143   : > { %v525_v56 = vadd.f32 %v974_v52, %v524_v50 }
 0x14a   : > { %v527_v51 = vpop.f32.mrf.mxu1  ;;  %v612_v58 = vpop.trf.xlu0 }
 0x14b   : > { %v528_v55 = vadd.f32 %v974_v52, %v527_v51 }
 0x152   : > { %v530_v53 = vpop.f32.mrf.mxu1 }
 0x153   : > { %v1303_v54 = vadd.f32 %v974_v52, %v530_v53 }
 0x155   : > { %644 = vmatpush.msra.mxu3 %v1303_v54 }
 0x157   : > { %645 = vmatpush.msra.mxu3 %v528_v55 }
 0x159   : > { %646 = vmatpush.msra.mxu3 %v525_v56 }
 0x15b   : > { %647 = vmatpush.msra.mxu3 %v522_v57 }
 0x15c   : > { %898 = vmatmul.msk.f32.vlgmr.msra.gmra.mxu3 %vm628_vm7, %v612_v58 }
 0x15d   : > { %899 = vmatpush.msk.msrb.mxu3 %vm547_vm0, %v655_v59 }
 0x164   : > { %900 = vmatmul.msk.f32.vlgmr.msrb.gmra.mxu3 %vm534_vm1, %v1230_v6 }
 0x16c   : > { %901 = vmatmul.msk.f32.gmra.mxu3 %vm534_vm1, %v1244_v10 }
 0x174   : > { %902 = vmatmul.msk.f32.gmra.mxu3 %vm534_vm1, %v1261_v15 }
 0x17c   : > { %903 = vmatmul.msk.f32.gmra.mxu3 %vm534_vm1, %v1283_v21 }
 0x1df   : > { %v649_v60 = vpop.f32.mrf.mxu3 }
 0x1e0   : > { %654 = vst [vmem:[%s395_s7] sm:$0xff] %v649_v60 }
 0x1e1   : > { %1002 = shalt.err (!%p999_p5)
}
 0x1e2   : > { %910 = dma.vmem_to_hbm [thread:$0]  (%p1184_p4), %s746_s20, 128, %s748_s27, %s728_s29   ;;  %v1088_v62 = vmov -3e+38   ;;  %vm722_vm0 = vcmask 1040384  }
 0x1e3   : > { %s880_s22 = sshll.u32 %s1319_s19, 1  ;;  %s907_s0 = sshll.u32 %s1077_s16, 1 }
 0x1e4   : > { %s1338_s24 = scalar_lea.vmem [#allocation4], %s880_s22  ;;  %s757_s20 = scalar_lea.hbm %s1393_s10, %s907_s0 }
 0x1e5   : > { %424 = vst [vmem:[%s1338_s24] sm:$0x3] %v1088_v62  ;;  %s759_s27 = sshll.u32 %s1338_s24, 4  ;;  %s761_s29 = sshll.u32 %s757_s20, 4  ;;  %s760_s27 = int_to_ptr.vmem [resolvable:$true] %s759_s27  ;;  %s762_s29 = int_to_ptr.hbm [resolvable:$true] %s761_s29 }
 0x1e6   : > { %s733_s16 = scalar_lea.sflag [#allocation5], %s1319_s19  ;;  %s1017_s30 = sshra.s32 %s762_s29, 4  ;;  %s1018_s30 = int_to_ptr.hbm [resolvable:$true] %s1017_s30 }
 0x1e7   : > { %v676_v61 = vpop.f32.mrf.mxu3  ;;  %s1019_s12 = scalar_lea.hbm %s1018_s30, 2  ;;  %s1023_s1 = scalar_lea.hbm %s1393_s10, 4 }
 0x1e8   : > { %vm688_vm8 = vcmp.eq.f32.partialorder %v676_v61, 0.0  ;;  %vm705_vm11 = vcmp.eq.f32.partialorder %v676_v61, 1.0  ;;  %p1020_p6 = scmp.ne.s32.totalorder %s1018_s30, %s1019_s12  ;;  %p1024_p10 = scmp.lt.s32.totalorder %s1018_s30, %s1393_s10 }
 0x1e9   : > { %v692_v1 = vsel %vm688_vm8, %v522_v57, -3e+38  ;;  %v709_v5 = vsel %vm705_vm11, %v522_v57, -3e+38  ;;  %p1025_p11 = scmp.lt.s32.totalorder %s1023_s1, %s1019_s12 }
 0x1ea   : > { %p1021_p7 = pnand %p1020_p6, %p1184_p4 }
 0x1eb   : > { %p1026_p12 = por %p1025_p11, %p1024_p10 }
 0x1ec   : > { %v724_v28 = vld [vmem:[%s1338_s24] sm:$0x3]  ;;  %p1022_p9 = pneg %p1021_p7 }
 0x1ee   : > { %p1027_p13 = pnand %p1026_p12, %p1022_p9 }
 0x1ef   : > { %v679_v63 = vpop.f32.mrf.mxu3 }
 0x1f0   : > { %vm689_vm9 = vcmp.eq.f32.partialorder %v679_v63, 0.0  ;;  %vm706_vm10 = vcmp.eq.f32.partialorder %v679_v63, 1.0 }
 0x1f1   : > { %v693_v2 = vsel %vm689_vm9, %v525_v56, -3e+38  ;;  %v710_v3 = vsel %vm706_vm10, %v525_v56, -3e+38 }
 0x1f2   : > { %v696_v10 = vmax.f32 %v692_v1, %v693_v2  ;;  %v713_v11 = vmax.f32 %v709_v5, %v710_v3 }
 0x1f7   : > { %v682_v0 = vpop.f32.mrf.mxu3 }
 0x1f8   : > { %vm690_vm12 = vcmp.eq.f32.partialorder %v682_v0, 0.0  ;;  %vm707_vm13 = vcmp.eq.f32.partialorder %v682_v0, 1.0 }
 0x1f9   : > { %v694_v6 = vsel %vm690_vm12, %v528_v55, -3e+38  ;;  %v711_v7 = vsel %vm707_vm13, %v528_v55, -3e+38 }
 0x1ff   : > { %v685_v4 = vpop.f32.mrf.mxu3 }
 0x200   : > { %vm691_vm14 = vcmp.eq.f32.partialorder %v685_v4, 0.0  ;;  %vm708_vm15 = vcmp.eq.f32.partialorder %v685_v4, 1.0 }
 0x201   : > { %v695_v8 = vsel %vm691_vm14, %v1303_v54, -3e+38  ;;  %v712_v9 = vsel %vm708_vm15, %v1303_v54, -3e+38 }
 0x202   : > { %v697_v12 = vmax.f32 %v694_v6, %v695_v8  ;;  %v714_v13 = vmax.f32 %v711_v7, %v712_v9 }
 0x204   : > { %v698_v14 = vmax.f32 %v696_v10, %v697_v12  ;;  %v715_v15 = vmax.f32 %v713_v11, %v714_v13 }
 0x206   : > { %v699_v16 = vrot.slane %v698_v14, 4  ;;  %v716_v17 = vrot.slane %v715_v15, 4 }
 0x208   : > { %v700_v18 = vmax.f32 %v698_v14, %v699_v16  ;;  %v717_v19 = vmax.f32 %v715_v15, %v716_v17 }
 0x20a   : > { %v701_v20 = vrot.slane %v700_v18, 2  ;;  %v718_v21 = vrot.slane %v717_v19, 2 }
 0x20c   : > { %v702_v22 = vmax.f32 %v700_v18, %v701_v20  ;;  %v719_v23 = vmax.f32 %v717_v19, %v718_v21 }
 0x20e   : > { %v703_v24 = vrot.slane %v702_v22, 1  ;;  %v720_v25 = vrot.slane %v719_v23, 1 }
 0x210   : > { %v704_v26 = vmax.f32 %v702_v22, %v703_v24  ;;  %v721_v27 = vmax.f32 %v719_v23, %v720_v25 }
 0x212   : > { %v723_v29 = vsel %vm722_vm0, %v704_v26, %v721_v27 }
 0x213   : > { %v725_v30 = vmax.f32 %v724_v28, %v723_v29 }
 0x215   : > { %726 = vst [vmem:[%s1338_s24] sm:$0x3] %v725_v30 }
 0x216   : > { %1030 = shalt.err (!%p1027_p13)
}
 0x217   : > { %911 = dma.vmem_to_hbm [thread:$0]  (%p1184_p4), %s760_s27, 32, %s762_s29, %s733_s16  }
 0x218 PF: > { %p921_p0 = scmp.ge.s32.totalorder %s1085_s18, 2  ;;  %s773_s19 = sand.u32 1, %s1065_s13  }
 0x219   : > { %s774_s24 = scalar_lea.sflag [#allocation3], %s773_s19 }
 0x21a   : > { %p915_p1 = pnand %p921_p0, %p1191_p8 }
 0x21c   : > { %p916_p2 = pneg %p915_p1 }
 0x21e   : > { %1056 = dma.done.wait (%p916_p2), %s774_s24, 128  }
 0x21f   : > { %1058 = vsyncadd (%p916_p2), %s774_s24, 4294967168  ;;  %s784_s2 = scalar_lea.sflag [#allocation5], %s773_s19 }
 0x220   : > { %1060 = dma.done.wait (%p916_p2), %s784_s2, 32  }
 0x221   : > { %1062 = vsyncadd (%p916_p2), %s784_s2, 4294967264  ;;  %s27_s18 = sadd.s32 1, %s1085_s18   ;;  %s1406_s13 = smov %s1069_s14 }
 0x222   : > { %p24_p3 = scmp.ge.s32.totalorder %s27_s18, 4   ;;  %s1407_s14 = smov %s1073_s15 }
 0x223   : > { %s1408_s15 = smov %s1197_s26  ;;  %s1409_s16 = smov %s1081_s17 }
 0x224   : > { %s1410_s17 = smov %s1412_s21  ;;  %26 = sbr.rel (!%p24_p3) target bundleno = 11 (0xb), region = 115 }
 0x229   :  { %790 = vsyncpa [#allocation3], 1 }
 0x22a   :  { %792 = vsyncpa [#allocation3 + $0x1], 1 }
 0x22b   :  { %793 = vsyncpa [#allocation5], 1 }
 0x22c   :  { %795 = vsyncpa [#allocation5 + $0x1], 1 }

</bundles_post_ra>
